<compile_context>
chip_gen: v6e
topology: v6e:2x2x1
jax: 0.10.0
libtpu: 0.0.40
codegen_flags: <defaults>
</compile_context>

<pallas_src>
import jax
import jax.numpy as jnp
from jax import lax
from jax.experimental import pallas as pl
from jax.experimental.pallas import tpu as pltpu


def _round_up(v, m):
    return ((v + m - 1) // m) * m


def _linear_kernel(b_ref, x_ref, w_ref, o_ref, acc_ref):
    """One (tm, tn) output tile, accumulated over the K grid axis.

    b_ref:   (1,)      scalar bias in SMEM (0.0 when the layer has no bias)
    x_ref:   (tm, tk)  activation tile in VMEM
    w_ref:   (tn, tk)  weight tile in VMEM (PyTorch layout, no transpose)
    o_ref:   (tm, tn)  output tile in VMEM
    acc_ref: (tm, tn)  f32 accumulator scratch, persistent across the K axis
    """
    k = pl.program_id(2)

    # Initialize the accumulator with the (scalar) bias on the first K step so
    # the bias is added exactly once regardless of the number of K tiles.
    @pl.when(k == 0)
    def _init():
        acc_ref[...] = jnp.full_like(acc_ref, b_ref[0])

    # NT contraction: contract x's K (axis 1) against W's K (axis 1) directly.
    # Avoids an in-VMEM transpose of the weight tile before it feeds the MXU.
    acc_ref[...] += lax.dot_general(
        x_ref[...],
        w_ref[...],
        dimension_numbers=(((1,), (1,)), ((), ())),
        preferred_element_type=jnp.float32,
    )

    @pl.when(k == pl.num_programs(2) - 1)
    def _finalize():
        o_ref[...] = acc_ref[...].astype(o_ref.dtype)


def linear_forward(x, weights, bias=None, *, tm=256, tn=256, tk=512):
    """Pallas equivalent of Linear.forward / Function.forward.

    x:       (M, K) float32  -- (batch, in_features)
    weights: (N, K) float32  -- (out_features, in_features), PyTorch layout
    bias:    optional (1,) float32 scalar parameter (broadcast-added)
    returns: (M, N) float32
    """
    x = jnp.asarray(x, jnp.float32)
    weights = jnp.asarray(weights, jnp.float32)

    M, K = x.shape
    N, K_w = weights.shape
    assert K == K_w, "in_features mismatch"

    # Clamp tile sizes to the (padded) problem size while respecting TPU
    # layout constraints: second-to-last block dim multiple of 8 (sublane),
    # last block dim multiple of 128 (lane).
    tm = min(tm, _round_up(M, 8))
    tn = min(tn, _round_up(N, 128))
    tk = min(tk, _round_up(K, 128))

    Mp = _round_up(M, tm)
    Np = _round_up(N, tn)
    Kp = _round_up(K, tk)

    # Zero-pad up to tile multiples (zeros contribute nothing to the matmul;
    # padded output rows/cols are sliced away below).
    x_p = x if (Mp == M and Kp == K) else jnp.pad(x, ((0, Mp - M), (0, Kp - K)))
    w_p = (weights if (Np == N and Kp == K)
           else jnp.pad(weights, ((0, Np - N), (0, Kp - K))))

    # Single kernel handles both bias / no-bias paths: a 0.0 scalar bias is
    # numerically identical to the no-bias branch of the reference module.
    if bias is None:
        bias_arr = jnp.zeros((1,), jnp.float32)
    else:
        bias_arr = jnp.asarray(bias, jnp.float32).reshape(1)

    grid = (Mp // tm, Np // tn, Kp // tk)

    grid_spec = pltpu.PrefetchScalarGridSpec(
        num_scalar_prefetch=0,
        grid=grid,
        in_specs=[
            # scalar bias lives in SMEM, untiled
            pl.BlockSpec(memory_space=pltpu.MemorySpace.SMEM),
            pl.BlockSpec((tm, tk), lambda i, j, k: (i, k)),   # x tile
            pl.BlockSpec((tn, tk), lambda i, j, k: (j, k)),   # W tile (NT)
        ],
        out_specs=pl.BlockSpec((tm, tn), lambda i, j, k: (i, j)),
        scratch_shapes=[pltpu.VMEM((tm, tn), jnp.float32)],
    )

    cost = pl.CostEstimate(
        flops=2 * M * N * K,
        transcendentals=0,
        bytes_accessed=4 * (M * K + N * K + M * N),
    )

    out_p = pl.pallas_call(
        _linear_kernel,
        out_shape=jax.ShapeDtypeStruct((Mp, Np), jnp.float32),
        grid_spec=grid_spec,
        compiler_params=pltpu.CompilerParams(
            dimension_semantics=("parallel", "parallel", "arbitrary"),
        ),
        cost_estimate=cost,
    )(bias_arr, x_p, w_p)

    if Mp == M and Np == N:
        return out_p
    return out_p[:M, :N]


class LinearPallas:
    """Mirror of the PyTorch `Linear` module (forward only)."""

    def __init__(self, i_n_features_input, i_n_features_output, bias=True, *, key):
        self.has_bias = bias
        k_w, k_b = jax.random.split(key)
        # torch.rand -> uniform [0, 1), float32
        self.weights = jax.random.uniform(
            k_w, (i_n_features_output, i_n_features_input), dtype=jnp.float32)
        if bias:
            self.bias = jax.random.uniform(k_b, (1,), dtype=jnp.float32)
        else:
            self.bias = None

    def __call__(self, i_input):
        if self.has_bias:
            return linear_forward(i_input, self.weights, self.bias)
        return linear_forward(i_input, self.weights)


if __name__ == "__main__":
    key = jax.random.PRNGKey(0)
    k_x, k_mod = jax.random.split(key)

    batch = 8
    n_features_input = 32
    n_features_output = 16

    x = jax.random.uniform(k_x, (batch, n_features_input), dtype=jnp.float32)

    # bias path
    module = LinearPallas(n_features_input, n_features_output, bias=True, key=k_mod)
    y = jax.block_until_ready(module(x))
    y_ref = x @ module.weights.T + module.bias
    assert y.shape == (batch, n_features_output)
    assert jnp.allclose(y, y_ref, atol=1e-5, rtol=1e-5)

    # no-bias path
    module_nb = LinearPallas(n_features_input, n_features_output, bias=False, key=k_mod)
    y_nb = jax.block_until_ready(module_nb(x))
    y_nb_ref = x @ module_nb.weights.T
    assert jnp.allclose(y_nb, y_nb_ref, atol=1e-5, rtol=1e-5)

    print("KERNEL_OK")
</pallas_src>

<mosaic_0001>
module attributes {stable_mosaic.version = 11 : i64} {
  func.func @_linear_kernel(%arg0: i32, %arg1: i32, %arg2: i32, %arg3: memref<1xf32, #tpu.memory_space<smem>>, %arg4: memref<8x128xf32, #tpu.memory_space<vmem>>, %arg5: memref<128x128xf32, #tpu.memory_space<vmem>>, %arg6: memref<8x128xf32, #tpu.memory_space<vmem>>, %arg7: memref<8x128xf32, #tpu.memory_space<vmem>>) attributes {dimension_semantics = [#tpu.dimension_semantics<parallel>, #tpu.dimension_semantics<parallel>, #tpu.dimension_semantics<arbitrary>], iteration_bounds = array<i64: 1, 1, 1>, scalar_prefetch = 0 : i64, scratch_operands = 1 : i64, tpu.core_type = #tpu.core_type<tc>, window_params = [{transform_indices = @transform_0, window_bounds = array<i64: 1>}, {transform_indices = @transform_1, window_bounds = array<i64: 8, 128>}, {transform_indices = @transform_2, window_bounds = array<i64: 128, 128>}, {transform_indices = @transform_3, window_bounds = array<i64: 8, 128>}]} {
    %c0_i32 = arith.constant 0 : i32
    %0 = arith.cmpi eq, %arg2, %c0_i32 : i32
    %1 = arith.extui %0 : i1 to i32
    %c0_i32_0 = arith.constant 0 : i32
    %2 = arith.cmpi ne, %1, %c0_i32_0 : i32
    scf.if %2 {
      %c0_10 = arith.constant 0 : index
      %12 = memref.load %arg3[%c0_10] : memref<1xf32, #tpu.memory_space<smem>>
      %13 = vector.broadcast %12 : f32 to vector<8x128xf32>
      %c0_11 = arith.constant 0 : index
      %c0_12 = arith.constant 0 : index
      %14 = vector.load %arg7[%c0_11, %c0_12] : memref<8x128xf32, #tpu.memory_space<vmem>>, vector<8x128xf32>
      tpu.vector_store %arg7[%c0_11, %c0_12], %13 {strides = array<i32>} : memref<8x128xf32, #tpu.memory_space<vmem>>, vector<8x128xf32>,
    } else {
    }
    %c0 = arith.constant 0 : index
    %c0_1 = arith.constant 0 : index
    %3 = vector.load %arg7[%c0, %c0_1] : memref<8x128xf32, #tpu.memory_space<vmem>>, vector<8x128xf32>
    %c0_2 = arith.constant 0 : index
    %c0_3 = arith.constant 0 : index
    %4 = vector.load %arg4[%c0_2, %c0_3] : memref<8x128xf32, #tpu.memory_space<vmem>>, vector<8x128xf32>
    %c0_4 = arith.constant 0 : index
    %c0_5 = arith.constant 0 : index
    %5 = vector.load %arg5[%c0_4, %c0_5] : memref<128x128xf32, #tpu.memory_space<vmem>>, vector<128x128xf32>
    %cst = arith.constant dense<0.000000e+00> : vector<8x128xf32>
    %6 = tpu.matmul %4, %5, %cst {dimension_numbers = #tpu.dot_dimension_numbers<[1], [1], [0], [0], [0, 0, 1, 0], [], []>} : vector<8x128xf32>, vector<128x128xf32>, vector<8x128xf32> -> vector<8x128xf32>
    %7 = arith.addf %3, %6 : vector<8x128xf32>
    %c0_6 = arith.constant 0 : index
    %c0_7 = arith.constant 0 : index
    %8 = vector.load %arg7[%c0_6, %c0_7] : memref<8x128xf32, #tpu.memory_space<vmem>>, vector<8x128xf32>
    tpu.vector_store %arg7[%c0_6, %c0_7], %7 {strides = array<i32>} : memref<8x128xf32, #tpu.memory_space<vmem>>, vector<8x128xf32>,
    %c0_i32_8 = arith.constant 0 : i32
    %9 = arith.cmpi eq, %arg2, %c0_i32_8 : i32
    %10 = arith.extui %9 : i1 to i32
    %c0_i32_9 = arith.constant 0 : i32
    %11 = arith.cmpi ne, %10, %c0_i32_9 : i32
    scf.if %11 {
      %c0_10 = arith.constant 0 : index
      %c0_11 = arith.constant 0 : index
      %12 = vector.load %arg7[%c0_10, %c0_11] : memref<8x128xf32, #tpu.memory_space<vmem>>, vector<8x128xf32>
      %c0_12 = arith.constant 0 : index
      %c0_13 = arith.constant 0 : index
      %13 = vector.load %arg6[%c0_12, %c0_13] : memref<8x128xf32, #tpu.memory_space<vmem>>, vector<8x128xf32>
      tpu.vector_store %arg6[%c0_12, %c0_13], %12 {strides = array<i32>} : memref<8x128xf32, #tpu.memory_space<vmem>>, vector<8x128xf32>,
    } else {
    }
    return
  }
  func.func @transform_0(%arg0: i32, %arg1: i32, %arg2: i32) -> i32 {
    %c0_i32 = arith.constant 0 : i32
    %c0_i32_0 = arith.constant 0 : i32
    return %c0_i32 : i32
  }
  func.func @transform_1(%arg0: i32, %arg1: i32, %arg2: i32) -> (i32, i32) {
    %c0_i32 = arith.constant 0 : i32
    return %arg0, %arg2 : i32, i32
  }
  func.func @transform_2(%arg0: i32, %arg1: i32, %arg2: i32) -> (i32, i32) {
    %c0_i32 = arith.constant 0 : i32
    return %arg1, %arg2 : i32, i32
  }
  func.func @transform_3(%arg0: i32, %arg1: i32, %arg2: i32) -> (i32, i32) {
    %c0_i32 = arith.constant 0 : i32
    return %arg0, %arg1 : i32, i32
  }
}

</mosaic_0001>

<bundles_post_ra>
// kernel: tpu_custom_call.1
= control target key start
LH: loop header
LB: loop body
LE: loop exit
PB: predicated region body
PF: predicated region fallthrough
CT: control target
= control target key end

     0   :  { %9 = vsyncpa [#allocation5], 0  ;;  %s324_s0 = inlined_call_operand.<no memory space> [shape: f32[1], index: 0, kind: input, shape index: {}]   ;;  %s325_s1 = inlined_call_operand.hbm [shape: f32[8,128], index: 1, kind: input, shape index: {}]   ;;  %s326_s2 = inlined_call_operand.hbm [shape: f32[128,128], index: 2, kind: input, shape index: {}]   ;;  %s327_s3 = inlined_call_operand.hbm [shape: f32[8,128], index: 3, kind: output, shape index: {}]  }
   0x1   :  { %10 = vsyncpa [#allocation8], 0 }
   0x2   :  { %11 = vsyncpa [#allocation6], 0  ;;  %s285_s12 = smov [#allocation4]   ;;  %s286_s14 = smov [#allocation7]  }
   0x3   :  { %s20_s13 = sshll.u32 %s285_s12, 4  ;;  %s29_s15 = sshll.u32 %s286_s14, 4  ;;  %s21_s13 = int_to_ptr.vmem [resolvable:$true] %s20_s13  ;;  %s30_s15 = int_to_ptr.vmem [resolvable:$true] %s29_s15 }
   0x4   :  { %s227_s16 = scalar_lea.vmem %s21_s13, 128  ;;  %p232_p1 = scmp.lt.s32.totalorder %s21_s13, %s21_s13 }
   0x5   :  { %p228_p0 = scmp.ne.s32.totalorder %s21_s13, %s227_s16  ;;  %p233_p2 = scmp.lt.s32.totalorder %s227_s16, %s227_s16 }
   0x7   :  { %p234_p3 = por %p233_p2, %p232_p1 }
   0x9   :  { %p235_p4 = pnand %p234_p3, %p228_p0 }
   0xb   :  { %238 = shalt.err (!%p235_p4)
}
   0xc   :  { %23 = dma.hbm_to_vmem [thread:$0]  %s325_s1, 128, %s21_s13, [#allocation5]  }
   0xd   :  { %s247_s19 = scalar_lea.vmem %s30_s15, 2048  ;;  %p252_p6 = scmp.lt.s32.totalorder %s30_s15, %s30_s15 }
   0xe   :  { %p248_p5 = scmp.ne.s32.totalorder %s30_s15, %s247_s19  ;;  %p253_p7 = scmp.lt.s32.totalorder %s247_s19, %s247_s19 }
  0x10   :  { %p254_p8 = por %p253_p7, %p252_p6 }
  0x12   :  { %p255_p9 = pnand %p254_p8, %p248_p5 }
  0x14   :  { %258 = shalt.err (!%p255_p9)
}
  0x15   :  { %s287_s20 = smov 128   ;;  %s288_s21 = smov 8  }
  0x16   :  { %35 = dma.hbm_to_vmem [thread:$0]  %s326_s2, 2048, %s30_s15, [#allocation8], %s287_s20, %s287_s20, %s288_s21  }
  0x17   :  { %279 = dma.done.wait [#allocation5], 128  }
  0x18   :  { %280 = vsyncadd [#allocation5], 4294967168 }
  0x19   :  { %281 = dma.done.wait [#allocation8], 2048  }
  0x1a   :  { %282 = vsyncadd [#allocation8], 4294965248  ;;  %v289_v0 = vmov 0.0   ;;  %vm290_vm0 = vmmov 0   ;;  %v66_v1 = vld [vmem:[#allocation7 + $0x78] sm:$0xff]  ;;  %v65_v2 = vld [vmem:[#allocation7 + $0x70] sm:$0xff]  ;;  %v47_v18 = vstv %s324_s0 }
  0x1b   :  { %177 = vmatprep.subr.mxu0 %v289_v0  ;;  %209 = vmatprep.mubr.msk.f32.mxu0 %vm290_vm0, %v289_v0  ;;  %v64_v3 = vld [vmem:[#allocation7 + $0x68] sm:$0xff]  ;;  %v63_v4 = vld [vmem:[#allocation7 + $0x60] sm:$0xff]  ;;  %v62_v5 = vld [vmem:[#allocation7 + $0x58] sm:$0xff]  ;;  %s291_s24 = smov [#allocation9]  }
  0x1c   :  { %178 = vmatpush3.xpose.msra.mxu0 %v66_v1  ;;  %v61_v6 = vld [vmem:[#allocation7 + $0x50] sm:$0xff]  ;;  %v60_v7 = vld [vmem:[#allocation7 + $0x48] sm:$0xff]  ;;  %v59_v8 = vld [vmem:[#allocation7 + $0x40] sm:$0xff]  ;;  %s150_s25 = sshll.u32 %s291_s24, 4  ;;  %s151_s25 = int_to_ptr.vmem [resolvable:$true] %s150_s25 }
  0x1d   :  { %179 = vmatprep.subr.mxu0 %v289_v0  ;;  %v58_v9 = vld [vmem:[#allocation7 + $0x38] sm:$0xff]  ;;  %v57_v10 = vld [vmem:[#allocation7 + $0x30] sm:$0xff]  ;;  %v56_v11 = vld [vmem:[#allocation7 + $0x28] sm:$0xff]  ;;  %s259_s26 = scalar_lea.vmem %s151_s25, 128  ;;  %p264_p11 = scmp.lt.s32.totalorder %s151_s25, %s151_s25 }
  0x1e   :  { %v55_v12 = vld [vmem:[#allocation7 + $0x20] sm:$0xff]  ;;  %v54_v13 = vld [vmem:[#allocation7 + $0x18] sm:$0xff]  ;;  %v53_v14 = vld [vmem:[#allocation7 + $0x10] sm:$0xff]  ;;  %p260_p10 = scmp.ne.s32.totalorder %s151_s25, %s259_s26  ;;  %p265_p12 = scmp.lt.s32.totalorder %s259_s26, %s259_s26 }
  0x1f   :  { %v52_v15 = vld [vmem:[#allocation7 + $0x8] sm:$0xff]  ;;  %v51_v16 = vld [vmem:[#allocation7] sm:$0xff]  ;;  %v50_v17 = vld [vmem:[#allocation4] sm:$0xff] }
  0x20   :  { %180 = vmatpush3.xpose.msra.mxu0 %v65_v2  ;;  %p266_p13 = por %p265_p12, %p264_p11 }
  0x21   :  { %181 = vmatprep.subr.mxu0 %v289_v0 }
  0x22   :  { %p267_p0 = pnand %p266_p13, %p260_p10 }
  0x24   :  { %182 = vmatpush3.xpose.msra.mxu0 %v64_v3 }
  0x25   :  { %183 = vmatprep.subr.mxu0 %v289_v0 }
  0x28   :  { %184 = vmatpush3.xpose.msra.mxu0 %v63_v4 }
  0x29   :  { %185 = vmatprep.subr.mxu0 %v289_v0 }
  0x2c   :  { %186 = vmatpush3.xpose.msra.mxu0 %v62_v5 }
  0x2d   :  { %187 = vmatprep.subr.mxu0 %v289_v0 }
  0x30   :  { %188 = vmatpush3.xpose.msra.mxu0 %v61_v6 }
  0x31   :  { %189 = vmatprep.subr.mxu0 %v289_v0 }
  0x34   :  { %190 = vmatpush3.xpose.msra.mxu0 %v60_v7 }
  0x35   :  { %191 = vmatprep.subr.mxu0 %v289_v0 }
  0x38   :  { %192 = vmatpush3.xpose.msra.mxu0 %v59_v8 }
  0x39   :  { %193 = vmatprep.subr.mxu0 %v289_v0 }
  0x3c   :  { %194 = vmatpush3.xpose.msra.mxu0 %v58_v9 }
  0x3d   :  { %195 = vmatprep.subr.mxu0 %v289_v0 }
  0x40   :  { %196 = vmatpush3.xpose.msra.mxu0 %v57_v10 }
  0x41   :  { %197 = vmatprep.subr.mxu0 %v289_v0 }
  0x44   :  { %198 = vmatpush3.xpose.msra.mxu0 %v56_v11 }
  0x45   :  { %199 = vmatprep.subr.mxu0 %v289_v0 }
  0x48   :  { %200 = vmatpush3.xpose.msra.mxu0 %v55_v12 }
  0x49   :  { %201 = vmatprep.subr.mxu0 %v289_v0 }
  0x4c   :  { %202 = vmatpush3.xpose.msra.mxu0 %v54_v13 }
  0x4d   :  { %203 = vmatprep.subr.mxu0 %v289_v0 }
  0x50   :  { %204 = vmatpush3.xpose.msra.mxu0 %v53_v14 }
  0x51   :  { %205 = vmatprep.subr.mxu0 %v289_v0 }
  0x54   :  { %206 = vmatpush3.xpose.msra.mxu0 %v52_v15 }
  0x55   :  { %207 = vmatprep.subr.mxu0 %v289_v0 }
  0x58   :  { %208 = vmatpush3.xpose.msra.mxu0 %v51_v16 }
  0x5b   :  { %210 = vmatmul.mubr.f32.vlgmr.msra.gmra.mxu0 %v50_v17 }
 0x11b   :  { %v133_v19 = vpop.f32.mrf.mxu0 }
 0x11c   :  { %v137_v20 = vadd.f32 %v133_v19, %v47_v18 }
 0x11d   :  { %v211_v21 = vpop.f32.mrf.mxu0 }
 0x11e   :  { %143 = vst [vmem:[#allocation9] sm:$0xff] %v137_v20 }
 0x11f   :  { %270 = shalt.err (!%p267_p0)
}
 0x120   :  { %153 = dma.vmem_to_hbm [thread:$0]  %s151_s25, 128, %s327_s3, [#allocation6]  }
 0x121   :  { %283 = dma.done.wait [#allocation6], 128  }
 0x122   :  { %284 = vsyncadd [#allocation6], 4294967168 }
 0x123   :  { %157 = vsyncpa [#allocation5], 1 }
 0x124   :  { %158 = vsyncpa [#allocation8], 1 }
 0x125   :  { %159 = vsyncpa [#allocation6], 1 }

</bundles_post_ra>
